<compile_context>
chip_gen: v7x
topology: tpu7x:2x2x1
jax: 0.10.0
libtpu: 0.0.40
codegen_flags: <defaults>
</compile_context>

<pallas_src>
import functools

import jax
import jax.numpy as jnp
from jax.experimental import pallas as pl
from jax.experimental.pallas import tpu as pltpu


def _point_in_area_kernel(pk_ref, l1_ref, l2_ref, *, shift_in_kernel):
    """pk_ref: (TB, K, S) packed input; l1_ref / l2_ref: (TB, S) outputs."""
    f32 = jnp.float32
    pk = pk_ref[...].astype(f32)              # single full-block load, upcast once
    c1 = pk[:, 0:3, :]                        # (TB, 3, S)
    tg = pk[:, 3:6, :]
    c2 = pk[:, 6:9, :]
    if shift_in_kernel:
        # target shifted one step left along the lane (sequence) axis via XLU
        # roll; the wrapped-around last column only feeds the final l2 column,
        # which the wrapper slice [:, :2S-1] discards.
        seq = tg.shape[-1]
        tg2 = pltpu.roll(tg, shift=seq - 1, axis=2)
        r_row = 9
    else:
        tg2 = pk[:, 9:12, :]                  # shifted target packed by wrapper
        r_row = 12
    r1 = pk[:, r_row, :]                      # (TB, S)
    r2 = pk[:, r_row + 1, :]

    d1 = c1 - tg
    d2 = c2 - tg2
    s1 = jnp.sum(d1 * d1, axis=1)             # (TB, S)
    s2 = jnp.sum(d2 * d2, axis=1)

    # Radius is constant over the 3 components: divide once after the reduce.
    l1_ref[...] = (jnp.sqrt(s1) / r1).astype(l1_ref.dtype)
    l2_ref[...] = (jnp.sqrt(s2) / r2).astype(l2_ref.dtype)


def _tpu_vmem_bytes():
    """Physical VMEM capacity; conservative fallback if the query fails."""
    try:
        info = pltpu.get_tpu_info()
        v = getattr(info, "vmem_capacity_bytes", None)
        if v:
            return int(v)
    except Exception:
        pass
    return 64 * 1024 * 1024  # v7x-sized conservative default


def _pick_batch_tile(batch, per_row_bytes, budget_bytes):
    """Batch rows per block: as big as the VMEM budget allows, multiple of 8
    (sublane-dense 2-D output blocks) or equal to the full batch, and at least
    two grid steps for large batches (keeps both v7x TensorCores busy)."""
    tb = max(1, budget_bytes // per_row_bytes)
    if tb >= batch:
        if batch >= 16:
            half = -(-batch // 2)
            return min(batch, -(-half // 8) * 8)
        return batch
    tb = max(8, (tb // 8) * 8)
    return min(tb, batch)


def point_in_area_loss(coords_t1, coords_t2, radius_t1, radius_t2, target,
                       *, batch_tile=None):
    """coords_*/target: (B, S, 3); radius_*: (B, S, 1). Returns (B, 2*S - 1).

    `batch_tile` (testing override) must be a multiple of 8 or equal to B.
    """
    B, S, C = coords_t1.shape
    if target.shape[0] != B:
        raise ValueError(
            "Shape mismatch! Number of samples in the prediction and target must be equal.")
    if target.shape[-1] < 3:
        raise ValueError(
            f"Target must be 3-dimensional (x, y, z), but got {target.shape[-1]}")
    assert coords_t2.shape == (B, S, C) and target.shape == (B, S, C)
    assert radius_t1.shape == (B, S, 1) and radius_t2.shape == (B, S, 1)

    out_dtype = jnp.result_type(coords_t1.dtype, coords_t2.dtype, target.dtype,
                                radius_t1.dtype, radius_t2.dtype)

    # In-kernel lane roll for the t2 target shift only when the sequence axis
    # is lane-aligned; otherwise the shifted target rides in the packed stream.
    shift_in_kernel = (S % 128 == 0)

    # Layout plumbing (one fused XLA pass): sequence on lanes, everything
    # packed sublane-dense into a single (B, K, S) input.
    def _t(x):
        return jnp.transpose(x, (0, 2, 1))

    tg = _t(target)                                       # (B, 3, S)
    parts = [_t(coords_t1), tg, _t(coords_t2)]
    if not shift_in_kernel:
        # target shifted left by one along the sequence; last column is junk
        # that is dropped by the final [:, :2S-1] selection.
        parts.append(jnp.concatenate([tg[:, :, 1:], tg[:, :, S - 1:S]], axis=2))
    parts += [_t(radius_t1), _t(radius_t2)]               # (B, 1, S) each
    packed = jnp.concatenate(parts, axis=1)               # (B, K, S)
    K = packed.shape[1]

    # Tile sizing: double-buffered working set ~1/8 of physical VMEM,
    # computed with the real element sizes and VMEM sublane/lane padding.
    in_itemsize = jnp.dtype(packed.dtype).itemsize
    out_itemsize = jnp.dtype(out_dtype).itemsize
    s_pad = -(-S // 128) * 128
    k_pad = -(-K // 8) * 8
    per_row = 2 * (k_pad * s_pad * in_itemsize + 2 * s_pad * out_itemsize)
    vmem_bytes = _tpu_vmem_bytes()
    budget = max(4 * 1024 * 1024, vmem_bytes // 8)
    TB = batch_tile if batch_tile is not None else _pick_batch_tile(B, per_row, budget)

    grid = (pl.cdiv(B, TB),)
    in_spec = pl.BlockSpec((TB, K, S), lambda b: (b, 0, 0))
    out_spec = pl.BlockSpec((TB, S), lambda b: (b, 0))

    kernel = functools.partial(_point_in_area_kernel,
                               shift_in_kernel=shift_in_kernel)

    l1, l2 = pl.pallas_call(
        kernel,
        out_shape=(jax.ShapeDtypeStruct((B, S), out_dtype),
                   jax.ShapeDtypeStruct((B, S), out_dtype)),
        grid=grid,
        in_specs=[in_spec],
        out_specs=(out_spec, out_spec),
        compiler_params=pltpu.CompilerParams(
            dimension_semantics=("parallel",),
            vmem_limit_bytes=min(vmem_bytes // 2, 64 * 1024 * 1024)),
    )(packed)

    # torch.cat((l1, l2[:, :-1]), dim=1) -> (B, 2S - 1); the invalid last l2
    # column (wrapped/padded target) is dropped here.
    return jnp.concatenate([l1, l2[:, : S - 1]], axis=1)


def point_in_area_loss_from_preds(preds, target):
    """Mirrors the PyTorch forward(preds: TrackPrediction, target)."""
    return point_in_area_loss(preds["coords_t1"], preds["coords_t2"],
                              preds["radius_t1"], preds["radius_t2"], target)


def _reference(coords_t1, coords_t2, radius_t1, radius_t2, target):
    d1 = coords_t1 - target
    d2 = coords_t2[:, :-1] - target[:, 1:]
    l1 = jnp.sqrt(jnp.sum((d1 / radius_t1) ** 2, axis=-1))
    l2 = jnp.sqrt(jnp.sum((d2 / radius_t2[:, :-1]) ** 2, axis=-1))
    return jnp.concatenate([l1, l2], axis=1)


if __name__ == "__main__":
    key = jax.random.PRNGKey(0)
    k1, k2, k3, k4, k5, k6 = jax.random.split(key, 6)

    # Small shapes matching the module: batch=2, seq_len=8, 3 coordinates.
    B, S = 2, 8
    coords_t1 = jax.random.normal(k1, (B, S, 3), dtype=jnp.float32)
    coords_t2 = jax.random.normal(k2, (B, S, 3), dtype=jnp.float32)
    target = jax.random.normal(k3, (B, S, 3), dtype=jnp.float32)
    radius_t1 = jax.random.uniform(k4, (B, S, 1), dtype=jnp.float32,
                                   minval=0.5, maxval=1.5)
    radius_t2 = jax.random.uniform(k5, (B, S, 1), dtype=jnp.float32,
                                   minval=0.5, maxval=1.5)

    out = point_in_area_loss(coords_t1, coords_t2, radius_t1, radius_t2, target)
    jax.block_until_ready(out)
    ref = _reference(coords_t1, coords_t2, radius_t1, radius_t2, target)
    assert out.shape == (B, 2 * S - 1), out.shape
    assert jnp.allclose(out, ref, atol=1e-5, rtol=1e-5), "mismatch vs reference"

    # Non-divisible batch: B=11 with a forced batch tile of 8 exercises the
    # partial edge block (reviewer correctness concern).
    B2 = 11
    kk = jax.random.split(k6, 5)
    c1b = jax.random.normal(kk[0], (B2, S, 3), dtype=jnp.float32)
    c2b = jax.random.normal(kk[1], (B2, S, 3), dtype=jnp.float32)
    tgb = jax.random.normal(kk[2], (B2, S, 3), dtype=jnp.float32)
    r1b = jax.random.uniform(kk[3], (B2, S, 1), dtype=jnp.float32,
                             minval=0.5, maxval=1.5)
    r2b = jax.random.uniform(kk[4], (B2, S, 1), dtype=jnp.float32,
                             minval=0.5, maxval=1.5)
    out2 = point_in_area_loss(c1b, c2b, r1b, r2b, tgb, batch_tile=8)
    jax.block_until_ready(out2)
    ref2 = _reference(c1b, c2b, r1b, r2b, tgb)
    assert out2.shape == (B2, 2 * S - 1), out2.shape
    assert jnp.allclose(out2, ref2, atol=1e-5, rtol=1e-5), "mismatch (edge block)"

    print("KERNEL_OK")
</pallas_src>

<mosaic_0001>
module attributes {stable_mosaic.version = 11 : i64} {
  func.func @_point_in_area_kernel(%arg0: i32, %arg1: memref<2x14x8xf32, #tpu.memory_space<vmem>>, %arg2: memref<2x8xf32, #tpu.memory_space<vmem>>, %arg3: memref<2x8xf32, #tpu.memory_space<vmem>>) attributes {dimension_semantics = [#tpu.dimension_semantics<parallel>], iteration_bounds = array<i64: 1>, scalar_prefetch = 0 : i64, scratch_operands = 0 : i64, tpu.core_type = #tpu.core_type<tc>, window_params = [{transform_indices = @transform_0, window_bounds = array<i64: 2, 14, 8>}, {transform_indices = @transform_1, window_bounds = array<i64: 2, 8>}, {transform_indices = @transform_2, window_bounds = array<i64: 2, 8>}]} {
    %c0 = arith.constant 0 : index
    %c0_0 = arith.constant 0 : index
    %c0_1 = arith.constant 0 : index
    %0 = vector.load %arg1[%c0, %c0_0, %c0_1] : memref<2x14x8xf32, #tpu.memory_space<vmem>>, vector<2x14x8xf32>
    %1 = vector.extract_strided_slice %0 {offsets = [0, 0, 0], sizes = [2, 3, 8], strides = [1, 1, 1]} : vector<2x14x8xf32> to vector<2x3x8xf32>
    %2 = vector.extract_strided_slice %0 {offsets = [0, 3, 0], sizes = [2, 3, 8], strides = [1, 1, 1]} : vector<2x14x8xf32> to vector<2x3x8xf32>
    %3 = vector.extract_strided_slice %0 {offsets = [0, 6, 0], sizes = [2, 3, 8], strides = [1, 1, 1]} : vector<2x14x8xf32> to vector<2x3x8xf32>
    %4 = vector.extract_strided_slice %0 {offsets = [0, 9, 0], sizes = [2, 3, 8], strides = [1, 1, 1]} : vector<2x14x8xf32> to vector<2x3x8xf32>
    %5 = vector.extract_strided_slice %0 {offsets = [0, 12, 0], sizes = [2, 1, 8], strides = [1, 1, 1]} : vector<2x14x8xf32> to vector<2x1x8xf32>
    %6 = vector.shape_cast %5 : vector<2x1x8xf32> to vector<2x8xf32>
    %7 = vector.extract_strided_slice %0 {offsets = [0, 13, 0], sizes = [2, 1, 8], strides = [1, 1, 1]} : vector<2x14x8xf32> to vector<2x1x8xf32>
    %8 = vector.shape_cast %7 : vector<2x1x8xf32> to vector<2x8xf32>
    %9 = arith.subf %1, %2 : vector<2x3x8xf32>
    %10 = arith.subf %3, %4 : vector<2x3x8xf32>
    %11 = arith.mulf %9, %9 : vector<2x3x8xf32>
    %cst = arith.constant dense<0.000000e+00> : vector<2x8xf32>
    %12 = vector.multi_reduction <add>, %11, %cst [1] : vector<2x3x8xf32> to vector<2x8xf32>
    %13 = arith.mulf %10, %10 : vector<2x3x8xf32>
    %cst_2 = arith.constant dense<0.000000e+00> : vector<2x8xf32>
    %14 = vector.multi_reduction <add>, %13, %cst_2 [1] : vector<2x3x8xf32> to vector<2x8xf32>
    %15 = math.sqrt %12 : vector<2x8xf32>
    %16 = arith.divf %15, %6 : vector<2x8xf32>
    %c0_3 = arith.constant 0 : index
    %c0_4 = arith.constant 0 : index
    %17 = vector.load %arg2[%c0_3, %c0_4] : memref<2x8xf32, #tpu.memory_space<vmem>>, vector<2x8xf32>
    tpu.vector_store %arg2[%c0_3, %c0_4], %16 {strides = array<i32>} : memref<2x8xf32, #tpu.memory_space<vmem>>, vector<2x8xf32>,
    %18 = math.sqrt %14 : vector<2x8xf32>
    %19 = arith.divf %18, %8 : vector<2x8xf32>
    %c0_5 = arith.constant 0 : index
    %c0_6 = arith.constant 0 : index
    %20 = vector.load %arg3[%c0_5, %c0_6] : memref<2x8xf32, #tpu.memory_space<vmem>>, vector<2x8xf32>
    tpu.vector_store %arg3[%c0_5, %c0_6], %19 {strides = array<i32>} : memref<2x8xf32, #tpu.memory_space<vmem>>, vector<2x8xf32>,
    return
  }
  func.func @transform_0(%arg0: i32) -> (i32, i32, i32) {
    %c0_i32 = arith.constant 0 : i32
    %c0_i32_0 = arith.constant 0 : i32
    %c0_i32_1 = arith.constant 0 : i32
    return %arg0, %c0_i32, %c0_i32_0 : i32, i32, i32
  }
  func.func @transform_1(%arg0: i32) -> (i32, i32) {
    %c0_i32 = arith.constant 0 : i32
    %c0_i32_0 = arith.constant 0 : i32
    return %arg0, %c0_i32 : i32, i32
  }
  func.func @transform_2(%arg0: i32) -> (i32, i32) {
    %c0_i32 = arith.constant 0 : i32
    %c0_i32_0 = arith.constant 0 : i32
    return %arg0, %c0_i32 : i32, i32
  }
}

</mosaic_0001>

<bundles_post_ra>
// kernel: tpu_custom_call.1
= control target key start
LH: loop header
LB: loop body
LE: loop exit
PB: predicated region body
PF: predicated region fallthrough
CT: control target
= control target key end

     0   :  { %8 = vsyncpa [#allocation3], 0  ;;  %s280_s0 = inlined_call_operand.vmem [shape: f32[2,14,8], index: 0, kind: input, shape index: {}]   ;;  %s281_s1 = inlined_call_operand.hbm [shape: f32[2,8], index: 1, kind: output, shape index: {0}]   ;;  %s282_s2 = inlined_call_operand.hbm [shape: f32[2,8], index: 2, kind: output, shape index: {1}]  }
   0x1   :  { %v12_v0 = vld [vmem:[%s280_s0] sm:$0xff]  ;;  %v13_v1 = vld [vmem:[%s280_s0 + $0x8] sm:$0x3f]  ;;  %v14_v2 = vld [vmem:[%s280_s0 + $0x10] sm:$0xff] }
   0x2   :  { %v15_v3 = vld [vmem:[%s280_s0 + $0x18] sm:$0x3f]  ;;  %v18_v4 = vrot.slane %v12_v0, 3  ;;  %v19_v5 = vrot.slane %v14_v2, 3  ;;  %v26_v6 = vrot.slane %v13_v1, 3 }
   0x3   :  { %v27_v7 = vrot.slane %v15_v3, 3 }
   0x4   :  { %9 = vsyncpa [#allocation5], 0  ;;  %v22_v8 = vsub.f32 %v12_v0, %v18_v4  ;;  %v23_v9 = vsub.f32 %v14_v2, %v19_v5  ;;  %v30_v10 = vsub.f32 %v12_v0, %v26_v6  ;;  %v31_v11 = vsub.f32 %v13_v1, %v26_v6  ;;  %s222_s0 = smov [#allocation2]   ;;  %s223_s18 = smov [#allocation4]  }
   0x5   :  { %v32_v12 = vsub.f32 %v14_v2, %v27_v7  ;;  %v33_v13 = vsub.f32 %v15_v3, %v27_v7  ;;  %vm36_vm0 = vcmask 59392   ;;  %vm59_vm1 = vcmask 1041408   ;;  %s138_s17 = sshll.u32 %s222_s0, 4  ;;  %s148_s19 = sshll.u32 %s223_s18, 4  ;;  %s139_s17 = int_to_ptr.vmem [resolvable:$true] %s138_s17  ;;  %s149_s19 = int_to_ptr.vmem [resolvable:$true] %s148_s19 }
   0x6   :  { %v34_v14 = vmul.f32 %v22_v8, %v22_v8  ;;  %v35_v15 = vmul.f32 %v23_v9, %v23_v9  ;;  %v51_v16 = vmul.f32 %v30_v10, %v30_v10  ;;  %v52_v17 = vmul.f32 %v31_v11, %v31_v11  ;;  %s174_s20 = scalar_lea.vmem %s139_s17, 32  ;;  %p179_p1 = scmp.lt.s32.totalorder %s139_s17, %s139_s17 }
   0x7   :  { %v53_v18 = vmul.f32 %v32_v12, %v32_v12  ;;  %v54_v19 = vmul.f32 %v33_v13, %v33_v13  ;;  %vm103_vm9 = vcmask 1045509   ;;  %vm106_vm11 = vcmask 62468   ;;  %p175_p0 = scmp.ne.s32.totalorder %s139_s17, %s174_s20  ;;  %p180_p2 = scmp.lt.s32.totalorder %s174_s20, %s174_s20 }
   0x8   :  { %v37_v20 = vsel %vm36_vm0, %v34_v14, 0.0  ;;  %v44_v21 = vsel %vm36_vm0, %v35_v15, 0.0  ;;  %v60_v22 = vrot.slane %v51_v16, 6  ;;  %v61_v23 = vrot.slane %v52_v17, 6 }
   0x9   :  { %v38_v24 = vrot.slane %v37_v20, 4  ;;  %v45_v25 = vrot.slane %v44_v21, 4  ;;  %v63_v26 = vrot.slane %v53_v18, 6  ;;  %v64_v27 = vrot.slane %v54_v19, 6  ;;  %p181_p3 = por %p180_p2, %p179_p1 }
   0xa   :  { %v62_v28 = vsel %vm59_vm1, %v60_v22, %v61_v23  ;;  %vm127_vm12 = vcmask 1046534  }
   0xb   :  { %v39_v29 = vadd.f32 %v38_v24, %v37_v20  ;;  %v46_v30 = vadd.f32 %v45_v25, %v44_v21  ;;  %v65_v31 = vsel %vm59_vm1, %v63_v26, %v64_v27  ;;  %v68_v32 = vsel %vm36_vm0, %v62_v28, 0.0  ;;  %p182_p4 = pnand %p181_p3, %p175_p0 }
   0xc   :  { %v69_v33 = vrot.slane %v68_v32, 4  ;;  %v75_v34 = vsel %vm36_vm0, %v65_v31, 0.0 }
   0xd   :  { %v40_v35 = vrot.slane %v39_v29, 2  ;;  %v47_v36 = vrot.slane %v46_v30, 2  ;;  %v76_v37 = vrot.slane %v75_v34, 4 }
   0xe   :  { %v70_v38 = vadd.f32 %v69_v33, %v68_v32 }
   0xf   :  { %v41_v39 = vadd.f32 %v40_v35, %v39_v29  ;;  %v48_v40 = vadd.f32 %v47_v36, %v46_v30  ;;  %v77_v41 = vadd.f32 %v76_v37, %v75_v34 }
  0x10   :  { %v71_v42 = vrot.slane %v70_v38, 2 }
  0x11   :  { %v42_v43 = vrot.slane %v41_v39, 1  ;;  %v49_v44 = vrot.slane %v48_v40, 1  ;;  %v78_v45 = vrot.slane %v77_v41, 2 }
  0x12   :  { %v72_v46 = vadd.f32 %v71_v42, %v70_v38 }
  0x13   :  { %v43_v47 = vadd.f32 %v42_v43, %v41_v39  ;;  %v50_v48 = vadd.f32 %v49_v44, %v48_v40  ;;  %v79_v49 = vadd.f32 %v78_v45, %v77_v41 }
  0x14   :  { %v73_v50 = vrot.slane %v72_v46, 1 }
  0x15   :  { %162 = vrsqrt.f32 %v43_v47  ;;  %v80_v52 = vrot.slane %v79_v49, 1  ;;  %vm84_vm2 = vcmp.eq.f32.partialorder %v43_v47, inf  ;;  %v87_v55 = vand.u32 2147483648, %v43_v47 }
  0x16   :  { %164 = vrsqrt.f32 %v50_v48  ;;  %v74_v51 = vadd.f32 %v73_v50, %v72_v46  ;;  %vm86_vm3 = vcmp.eq.f32.partialorder %v43_v47, 0.0  ;;  %vm91_vm4 = vcmp.eq.f32.partialorder %v50_v48, inf }
  0x17   :  { %166 = vrcp.f32 %v13_v1  ;;  %v81_v53 = vadd.f32 %v80_v52, %v79_v49  ;;  %v94_v58 = vand.u32 2147483648, %v50_v48  ;;  %vm93_vm5 = vcmp.eq.f32.partialorder %v50_v48, 0.0 }
  0x18   :  { %168 = vrcp.f32 %v15_v3  ;;  %vm110_vm6 = vcmp.eq.f32.partialorder %v74_v51, inf  ;;  %v113_v2 = vand.u32 2147483648, %v74_v51  ;;  %vm112_vm7 = vcmp.eq.f32.partialorder %v74_v51, 0.0 }
  0x19   :  { %170 = vrsqrt.f32 %v74_v51  ;;  %vm117_vm8 = vcmp.eq.f32.partialorder %v81_v53, inf  ;;  %v120_v8 = vand.u32 2147483648, %v81_v53  ;;  %vm119_vm10 = vcmp.eq.f32.partialorder %v81_v53, 0.0 }
  0x1a   :  { %172 = vrsqrt.f32 %v81_v53 }
  0x1f   :  { %v163_v54 = vpop.eup %162 }
  0x20   :  { %v165_v56 = vpop.eup %164  ;;  %v83_v57 = vmul.f32 %v163_v54, %v43_v47 }
  0x21   :  { %v167_v59 = vpop.eup %166  ;;  %v90_v60 = vmul.f32 %v165_v56, %v50_v48 }
  0x22   :  { %v169_v61 = vpop.eup %168  ;;  %v85_v62 = vsel %vm84_vm2, %v43_v47, %v83_v57 }
  0x23   :  { %v171_v63 = vpop.eup %170  ;;  %v88_v0 = vsel %vm86_vm3, %v87_v55, %v85_v62  ;;  %v92_v1 = vsel %vm91_vm4, %v50_v48, %v90_v60 }
  0x24   :  { %v95_v3 = vsel %vm93_vm5, %v94_v58, %v92_v1  ;;  %v109_v4 = vmul.f32 %v171_v63, %v74_v51  ;;  %v173_v5 = vpop.eup %172  ;;  %v97_v6 = vmul.f32 %v167_v59, %v88_v0 }
  0x25   :  { %v99_v7 = vmul.f32 %v169_v61, %v95_v3  ;;  %v116_v10 = vmul.f32 %v173_v5, %v81_v53 }
  0x26   :  { %v111_v9 = vsel %vm110_vm6, %v74_v51, %v109_v4 }
  0x27   :  { %v102_v11 = vrot.slane %v99_v7, 7  ;;  %v114_v12 = vsel %vm112_vm7, %v113_v2, %v111_v9  ;;  %v118_v13 = vsel %vm117_vm8, %v81_v53, %v116_v10 }
  0x28   :  { %v121_v15 = vsel %vm119_vm10, %v120_v8, %v118_v13  ;;  %v122_v16 = vmul.f32 %v167_v59, %v114_v12 }
  0x29   :  { %v104_v14 = vsel %vm103_vm9, %v102_v11, %v97_v6  ;;  %v123_v17 = vmul.f32 %v169_v61, %v121_v15 }
  0x2a   :  { %107 = vst.msk [vmem:[#allocation2 - $0x4] sm:$0x30] %vm106_vm11, %v104_v14 }
  0x2b   :  { %185 = shalt.err (!%p182_p4)
}
  0x2c   :  { %s186_s23 = scalar_lea.hbm %s281_s1, 32 }
  0x2d   :  { %p187_p5 = scmp.ne.s32.totalorder %s281_s1, %s186_s23  ;;  %p190_p6 = scmp.lt.u32.totalorder %s186_s23, %s281_s1 }
  0x2f   :  { %p192_p7 = pnand %p190_p6, %p187_p5 }
  0x31   :  { %195 = shalt.err (!%p192_p7)
}
  0x32   :  { %141 = dma.vmem_to_hbm [thread:$0]  %s139_s17, 32, %s281_s1, [#allocation3]   ;;  %v126_v18 = vrot.slane %v123_v17, 7  ;;  %vm130_vm13 = vcmask 63493  }
  0x33   :  { %s196_s30 = scalar_lea.vmem %s149_s19, 32  ;;  %p201_p9 = scmp.lt.s32.totalorder %s149_s19, %s149_s19 }
  0x34   :  { %v128_v19 = vsel %vm127_vm12, %v126_v18, %v122_v16  ;;  %p197_p8 = scmp.ne.s32.totalorder %s149_s19, %s196_s30  ;;  %p202_p10 = scmp.lt.s32.totalorder %s196_s30, %s196_s30 }
  0x35   :  { %131 = vst.msk [vmem:[#allocation4 - $0x5] sm:$0x60] %vm130_vm13, %v128_v19 }
  0x36   :  { %p203_p11 = por %p202_p10, %p201_p9 }
  0x38   :  { %p204_p12 = pnand %p203_p11, %p197_p8 }
  0x3a   :  { %207 = shalt.err (!%p204_p12)
}
  0x3b   :  { %s208_s5 = scalar_lea.hbm %s282_s2, 32 }
  0x3c   :  { %p209_p13 = scmp.ne.s32.totalorder %s282_s2, %s208_s5  ;;  %p212_p0 = scmp.lt.u32.totalorder %s208_s5, %s282_s2 }
  0x3e   :  { %p214_p1 = pnand %p212_p0, %p209_p13 }
  0x40   :  { %217 = shalt.err (!%p214_p1)
}
  0x41   :  { %151 = dma.vmem_to_hbm [thread:$0]  %s149_s19, 32, %s282_s2, [#allocation5]  }
  0x42   :  { %218 = dma.done.wait [#allocation3], 32  }
  0x43   :  { %219 = vsyncadd [#allocation3], 4294967264 }
  0x44   :  { %220 = dma.done.wait [#allocation5], 32  }
  0x45   :  { %221 = vsyncadd [#allocation5], 4294967264 }
  0x46   :  { %158 = vsyncpa [#allocation3], 1 }
  0x47   :  { %159 = vsyncpa [#allocation5], 1 }

</bundles_post_ra>
